<compile_context>
chip_gen: v6e
topology: v6e:2x2x1
jax: 0.10.0
libtpu: 0.0.40
codegen_flags: <defaults>
</compile_context>

<pallas_src>
import functools

import jax
import jax.numpy as jnp
from jax.experimental import pallas as pl
from jax.experimental.pallas import tpu as pltpu


def _layernorm(x, gamma, beta, eps):
    # x: (..., D) f32; gamma/beta: (1, D) f32.
    mean = jnp.mean(x, axis=-1, keepdims=True)
    xc = x - mean
    var = jnp.mean(xc * xc, axis=-1, keepdims=True)
    inv = jax.lax.rsqrt(var + eps)                     # EUP rsqrt
    return xc * inv * gamma + beta


def _postln_block_kernel(x_ref, wqkv_ref, wout_ref, bout_ref,
                         w1_ref, b1_ref, w2_ref, b2_ref,
                         g1_ref, beta1_ref, g2_ref, beta2_ref,
                         o_ref, *, heads, dim_head, mu, eps):
    bt, n, d = x_ref.shape
    inner = heads * dim_head

    x_f32 = x_ref[...].astype(jnp.float32)             # residual path in f32
    x2d_bf = x_ref[...].reshape(bt * n, d).astype(jnp.bfloat16)

    # ---- Attention ----
    # Fused QKV projection; the softmax scale is already folded into the Q
    # columns of wqkv (done once in the wrapper).
    qkv = jnp.dot(x2d_bf, wqkv_ref[...],
                  preferred_element_type=jnp.float32)   # (bt*n, 3*inner) f32

    def head_major(col0):
        # Gather heads out of the lane dim into a leading batch dim:
        # (bt*n, inner) columns -> (bt*heads, n, dim_head).
        parts = []
        for h in range(heads):                          # static, tiny copies
            sl = qkv[:, col0 + h * dim_head: col0 + (h + 1) * dim_head]
            parts.append(sl.reshape(bt, 1, n, dim_head))
        stacked = jnp.concatenate(parts, axis=1)        # (bt, heads, n, dh)
        return stacked.reshape(bt * heads, n, dim_head).astype(jnp.bfloat16)

    q = head_major(0 * inner)
    k = head_major(1 * inner)
    v = head_major(2 * inner)

    # All (batch, head) pairs in a single batched contraction each.
    s = jnp.einsum('bnd,bmd->bnm', q, k,
                   preferred_element_type=jnp.float32)  # (bt*heads, n, n) f32
    s = s - jnp.max(s, axis=-1, keepdims=True)          # stable softmax
    e = jnp.exp(s)
    p = e * pl.reciprocal(jnp.sum(e, axis=-1, keepdims=True), approx=True)

    ctx = jnp.einsum('bnm,bmd->bnd', p.astype(jnp.bfloat16), v,
                     preferred_element_type=jnp.float32)  # (bt*heads, n, dh)
    ctx = ctx.reshape(bt, heads, n, dim_head)
    # b n (h d): merge heads back into the lane dim for the output projection.
    ctx = jnp.concatenate([ctx[:, h] for h in range(heads)], axis=-1)
    ctx = ctx.reshape(bt * n, inner).astype(jnp.bfloat16)

    attn_out = jnp.dot(ctx, wout_ref[...],
                       preferred_element_type=jnp.float32) + bout_ref[...]
    attn_out = attn_out.reshape(bt, n, d)

    # Residual 1 + LayerNorm 1.
    x1 = _layernorm(attn_out + mu * x_f32, g1_ref[...], beta1_ref[...], eps)

    # ---- FeedForward (MLP) ----
    h1 = jnp.dot(x1.reshape(bt * n, d).astype(jnp.bfloat16), w1_ref[...],
                 preferred_element_type=jnp.float32) + b1_ref[...]
    h1 = jnp.maximum(h1, 0.0)                           # ReLU in f32
    y = jnp.dot(h1.astype(jnp.bfloat16), w2_ref[...],
                preferred_element_type=jnp.float32) + b2_ref[...]
    y = y.reshape(bt, n, d)

    # Residual 2 + LayerNorm 2.
    x2 = _layernorm(y + mu * x1, g2_ref[...], beta2_ref[...], eps)
    o_ref[...] = x2.astype(o_ref.dtype)


def postln_block(x, wqkv, wout, bout, w1, b1, w2, b2, g1, beta1, g2, beta2,
                 *, heads, dim_head, mu, eps=1e-5, batch_tile=None):
    B, N, D = x.shape
    inner = heads * dim_head
    hidden = w1.shape[1]
    scale = float(dim_head) ** -0.5

    # Fat batch blocks amortize per-grid-step overhead; keep >= 2 steps when
    # possible so both v7x TensorCores get work ("parallel" axis).
    if batch_tile is None:
        batch_tile = B // 2 if (B >= 2 and B % 2 == 0) else B
    assert B % batch_tile == 0, "batch_tile must divide B"
    grid = (B // batch_tile,)

    # Fold the softmax scale into the Q columns of Wqkv (scalar commutes with
    # the contraction), then cast matmul weights to bf16 (f32 accumulation in
    # the kernel). Biases / LayerNorm params stay f32.
    wqkv_s = wqkv.at[:, :inner].multiply(scale)
    wqkv_bf = wqkv_s.astype(jnp.bfloat16)
    wout_bf = wout.astype(jnp.bfloat16)
    w1_bf = w1.astype(jnp.bfloat16)
    w2_bf = w2.astype(jnp.bfloat16)

    kernel = functools.partial(_postln_block_kernel,
                               heads=heads, dim_head=dim_head,
                               mu=float(mu), eps=float(eps))

    def full_spec(arr):
        nd = arr.ndim
        return pl.BlockSpec(arr.shape, lambda b, _nd=nd: (0,) * _nd)

    params = (wqkv_bf, wout_bf, bout, w1_bf, b1, w2_bf, b2, g1, beta1, g2, beta2)
    in_specs = [pl.BlockSpec((batch_tile, N, D), lambda b: (b, 0, 0))] + \
               [full_spec(p) for p in params]

    flops = (2 * B * N * D * 3 * inner            # QKV projection
             + 2 * B * heads * N * N * dim_head * 2  # QK^T and attn @ V
             + 2 * B * N * inner * D              # to_out projection
             + 2 * B * N * D * hidden * 2)        # MLP
    transcendentals = B * heads * N * N + 4 * B * N
    bytes_accessed = (x.size * 4 * 2
                      + 2 * (wqkv.size + wout.size + w1.size + w2.size)
                      + 4 * (bout.size + b1.size + b2.size
                             + g1.size + beta1.size + g2.size + beta2.size))

    return pl.pallas_call(
        kernel,
        out_shape=jax.ShapeDtypeStruct((B, N, D), x.dtype),
        grid_spec=pltpu.PrefetchScalarGridSpec(
            num_scalar_prefetch=0,
            grid=grid,
            in_specs=in_specs,
            out_specs=pl.BlockSpec((batch_tile, N, D), lambda b: (b, 0, 0)),
        ),
        compiler_params=pltpu.CompilerParams(
            dimension_semantics=("parallel",),
            vmem_limit_bytes=32 * 1024 * 1024,
        ),
        cost_estimate=pl.CostEstimate(flops=int(flops),
                                      transcendentals=int(transcendentals),
                                      bytes_accessed=int(bytes_accessed)),
    )(x, *params)


def _reference(x, wqkv, wout, bout, w1, b1, w2, b2, g1, beta1, g2, beta2,
               *, heads, dim_head, mu, eps=1e-5):
    # Pure-JAX (f32) reference mirroring the PyTorch PostLNBlock forward.
    B, N, D = x.shape
    inner = heads * dim_head
    scale = float(dim_head) ** -0.5
    qkv = x @ wqkv
    q, k, v = jnp.split(qkv, 3, axis=-1)

    def split_heads(t):  # b n (h d) -> b h n d
        return t.reshape(B, N, heads, dim_head).transpose(0, 2, 1, 3)

    q, k, v = map(split_heads, (q, k, v))
    dots = jnp.einsum('bhnd,bhmd->bhnm', q, k) * scale
    attn = jax.nn.softmax(dots, axis=-1)
    out = jnp.einsum('bhnm,bhmd->bhnd', attn, v)
    out = out.transpose(0, 2, 1, 3).reshape(B, N, inner)
    out = out @ wout + bout

    def ln(t, g, b):
        m = t.mean(-1, keepdims=True)
        va = ((t - m) ** 2).mean(-1, keepdims=True)
        return (t - m) / jnp.sqrt(va + eps) * g + b

    x1 = ln(out + mu * x, g1, beta1)
    h = jnp.maximum(x1 @ w1 + b1, 0.0)
    y = h @ w2 + b2
    return ln(y + mu * x1, g2, beta2)


if __name__ == "__main__":
    # Small config consistent with the module.
    B, N, D = 2, 8, 32
    heads, dim_head = 4, 8
    hidden_dim = 64
    mu = 0.9
    inner = heads * dim_head

    key = jax.random.PRNGKey(0)
    ks = jax.random.split(key, 12)
    x = jax.random.normal(ks[0], (B, N, D), dtype=jnp.float32)

    # PyTorch Linear shapes, pre-transposed to (in, out).
    wqkv = jax.random.normal(ks[1], (D, 3 * inner), dtype=jnp.float32) * 0.05
    wout = jax.random.normal(ks[2], (inner, D), dtype=jnp.float32) * 0.05
    bout = jax.random.normal(ks[3], (1, D), dtype=jnp.float32) * 0.02
    w1 = jax.random.normal(ks[4], (D, hidden_dim), dtype=jnp.float32) * 0.05
    b1 = jax.random.normal(ks[5], (1, hidden_dim), dtype=jnp.float32) * 0.02
    w2 = jax.random.normal(ks[6], (hidden_dim, D), dtype=jnp.float32) * 0.05
    b2 = jax.random.normal(ks[7], (1, D), dtype=jnp.float32) * 0.02
    # LayerNorm affine params (perturbed from default 1/0 so the test exercises them).
    g1 = 1.0 + 0.1 * jax.random.normal(ks[8], (1, D), dtype=jnp.float32)
    beta1 = 0.1 * jax.random.normal(ks[9], (1, D), dtype=jnp.float32)
    g2 = 1.0 + 0.1 * jax.random.normal(ks[10], (1, D), dtype=jnp.float32)
    beta2 = 0.1 * jax.random.normal(ks[11], (1, D), dtype=jnp.float32)

    out = postln_block(x, wqkv, wout, bout, w1, b1, w2, b2, g1, beta1, g2, beta2,
                       heads=heads, dim_head=dim_head, mu=mu)
    out = jax.block_until_ready(out)

    ref = _reference(x, wqkv, wout, bout, w1, b1, w2, b2, g1, beta1, g2, beta2,
                     heads=heads, dim_head=dim_head, mu=mu)
    assert out.shape == (B, N, D)
    # bf16 matmul operands + approx reciprocal -> loosened tolerance vs f32 reference.
    assert jnp.allclose(out, ref, atol=3e-2, rtol=3e-2), "mismatch vs reference"

    print("KERNEL_OK")
</pallas_src>

<mosaic_0001>
module attributes {stable_mosaic.version = 11 : i64} {
  func.func @_postln_block_kernel(%arg0: i32, %arg1: memref<1x8x32xf32, #tpu.memory_space<vmem>>, %arg2: memref<32x96xbf16, #tpu.memory_space<vmem>>, %arg3: memref<32x32xbf16, #tpu.memory_space<vmem>>, %arg4: memref<1x32xf32, #tpu.memory_space<vmem>>, %arg5: memref<32x64xbf16, #tpu.memory_space<vmem>>, %arg6: memref<1x64xf32, #tpu.memory_space<vmem>>, %arg7: memref<64x32xbf16, #tpu.memory_space<vmem>>, %arg8: memref<1x32xf32, #tpu.memory_space<vmem>>, %arg9: memref<1x32xf32, #tpu.memory_space<vmem>>, %arg10: memref<1x32xf32, #tpu.memory_space<vmem>>, %arg11: memref<1x32xf32, #tpu.memory_space<vmem>>, %arg12: memref<1x32xf32, #tpu.memory_space<vmem>>, %arg13: memref<1x8x32xf32, #tpu.memory_space<vmem>>) attributes {dimension_semantics = [#tpu.dimension_semantics<parallel>], iteration_bounds = array<i64: 2>, scalar_prefetch = 0 : i64, scratch_operands = 0 : i64, tpu.core_type = #tpu.core_type<tc>, window_params = [{transform_indices = @transform_0, window_bounds = array<i64: 1, 8, 32>}, {pipeline_mode = #tpu.pipeline_mode<synchronous>, transform_indices = @transform_1, window_bounds = array<i64: 32, 96>}, {pipeline_mode = #tpu.pipeline_mode<synchronous>, transform_indices = @transform_2, window_bounds = array<i64: 32, 32>}, {pipeline_mode = #tpu.pipeline_mode<synchronous>, transform_indices = @transform_3, window_bounds = array<i64: 1, 32>}, {pipeline_mode = #tpu.pipeline_mode<synchronous>, transform_indices = @transform_4, window_bounds = array<i64: 32, 64>}, {pipeline_mode = #tpu.pipeline_mode<synchronous>, transform_indices = @transform_5, window_bounds = array<i64: 1, 64>}, {pipeline_mode = #tpu.pipeline_mode<synchronous>, transform_indices = @transform_6, window_bounds = array<i64: 64, 32>}, {pipeline_mode = #tpu.pipeline_mode<synchronous>, transform_indices = @transform_7, window_bounds = array<i64: 1, 32>}, {pipeline_mode = #tpu.pipeline_mode<synchronous>, transform_indices = @transform_8, window_bounds = array<i64: 1, 32>}, {pipeline_mode = #tpu.pipeline_mode<synchronous>, transform_indices = @transform_9, window_bounds = array<i64: 1, 32>}, {pipeline_mode = #tpu.pipeline_mode<synchronous>, transform_indices = @transform_10, window_bounds = array<i64: 1, 32>}, {pipeline_mode = #tpu.pipeline_mode<synchronous>, transform_indices = @transform_11, window_bounds = array<i64: 1, 32>}, {transform_indices = @transform_12, window_bounds = array<i64: 1, 8, 32>}]} {
    %c0 = arith.constant 0 : index
    %c0_0 = arith.constant 0 : index
    %c0_1 = arith.constant 0 : index
    %0 = vector.load %arg1[%c0, %c0_0, %c0_1] : memref<1x8x32xf32, #tpu.memory_space<vmem>>, vector<1x8x32xf32>
    %c0_2 = arith.constant 0 : index
    %c0_3 = arith.constant 0 : index
    %c0_4 = arith.constant 0 : index
    %1 = vector.load %arg1[%c0_2, %c0_3, %c0_4] : memref<1x8x32xf32, #tpu.memory_space<vmem>>, vector<1x8x32xf32>
    %2 = vector.shape_cast %1 : vector<1x8x32xf32> to vector<8x32xf32>
    %3 = arith.truncf %2 : vector<8x32xf32> to vector<8x32xbf16>
    %c0_5 = arith.constant 0 : index
    %c0_6 = arith.constant 0 : index
    %4 = vector.load %arg2[%c0_5, %c0_6] : memref<32x96xbf16, #tpu.memory_space<vmem>>, vector<32x96xbf16>
    %cst = arith.constant dense<0.000000e+00> : vector<8x96xf32>
    %5 = tpu.matmul %3, %4, %cst {dimension_numbers = #tpu.dot_dimension_numbers<[1], [0], [0], [1], [0, 0, 1, 1], [], []>} : vector<8x32xbf16>, vector<32x96xbf16>, vector<8x96xf32> -> vector<8x96xf32>
    %6 = vector.extract_strided_slice %5 {offsets = [0, 0], sizes = [8, 8], strides = [1, 1]} : vector<8x96xf32> to vector<8x8xf32>
    %7 = vector.shape_cast %6 : vector<8x8xf32> to vector<1x1x8x8xf32>
    %8 = vector.extract_strided_slice %5 {offsets = [0, 8], sizes = [8, 8], strides = [1, 1]} : vector<8x96xf32> to vector<8x8xf32>
    %9 = vector.shape_cast %8 : vector<8x8xf32> to vector<1x1x8x8xf32>
    %10 = vector.extract_strided_slice %5 {offsets = [0, 16], sizes = [8, 8], strides = [1, 1]} : vector<8x96xf32> to vector<8x8xf32>
    %11 = vector.shape_cast %10 : vector<8x8xf32> to vector<1x1x8x8xf32>
    %12 = vector.extract_strided_slice %5 {offsets = [0, 24], sizes = [8, 8], strides = [1, 1]} : vector<8x96xf32> to vector<8x8xf32>
    %13 = vector.shape_cast %12 : vector<8x8xf32> to vector<1x1x8x8xf32>
    %14 = tpu.concatenate %7, %9, %11, %13 in 1 : vector<1x1x8x8xf32>, vector<1x1x8x8xf32>, vector<1x1x8x8xf32>, vector<1x1x8x8xf32> -> vector<1x4x8x8xf32>
    %15 = vector.shape_cast %14 : vector<1x4x8x8xf32> to vector<4x8x8xf32>
    %16 = arith.truncf %15 : vector<4x8x8xf32> to vector<4x8x8xbf16>
    %17 = vector.extract_strided_slice %5 {offsets = [0, 32], sizes = [8, 8], strides = [1, 1]} : vector<8x96xf32> to vector<8x8xf32>
    %18 = vector.shape_cast %17 : vector<8x8xf32> to vector<1x1x8x8xf32>
    %19 = vector.extract_strided_slice %5 {offsets = [0, 40], sizes = [8, 8], strides = [1, 1]} : vector<8x96xf32> to vector<8x8xf32>
    %20 = vector.shape_cast %19 : vector<8x8xf32> to vector<1x1x8x8xf32>
    %21 = vector.extract_strided_slice %5 {offsets = [0, 48], sizes = [8, 8], strides = [1, 1]} : vector<8x96xf32> to vector<8x8xf32>
    %22 = vector.shape_cast %21 : vector<8x8xf32> to vector<1x1x8x8xf32>
    %23 = vector.extract_strided_slice %5 {offsets = [0, 56], sizes = [8, 8], strides = [1, 1]} : vector<8x96xf32> to vector<8x8xf32>
    %24 = vector.shape_cast %23 : vector<8x8xf32> to vector<1x1x8x8xf32>
    %25 = tpu.concatenate %18, %20, %22, %24 in 1 : vector<1x1x8x8xf32>, vector<1x1x8x8xf32>, vector<1x1x8x8xf32>, vector<1x1x8x8xf32> -> vector<1x4x8x8xf32>
    %26 = vector.shape_cast %25 : vector<1x4x8x8xf32> to vector<4x8x8xf32>
    %27 = arith.truncf %26 : vector<4x8x8xf32> to vector<4x8x8xbf16>
    %28 = vector.extract_strided_slice %5 {offsets = [0, 64], sizes = [8, 8], strides = [1, 1]} : vector<8x96xf32> to vector<8x8xf32>
    %29 = vector.shape_cast %28 : vector<8x8xf32> to vector<1x1x8x8xf32>
    %30 = vector.extract_strided_slice %5 {offsets = [0, 72], sizes = [8, 8], strides = [1, 1]} : vector<8x96xf32> to vector<8x8xf32>
    %31 = vector.shape_cast %30 : vector<8x8xf32> to vector<1x1x8x8xf32>
    %32 = vector.extract_strided_slice %5 {offsets = [0, 80], sizes = [8, 8], strides = [1, 1]} : vector<8x96xf32> to vector<8x8xf32>
    %33 = vector.shape_cast %32 : vector<8x8xf32> to vector<1x1x8x8xf32>
    %34 = vector.extract_strided_slice %5 {offsets = [0, 88], sizes = [8, 8], strides = [1, 1]} : vector<8x96xf32> to vector<8x8xf32>
    %35 = vector.shape_cast %34 : vector<8x8xf32> to vector<1x1x8x8xf32>
    %36 = tpu.concatenate %29, %31, %33, %35 in 1 : vector<1x1x8x8xf32>, vector<1x1x8x8xf32>, vector<1x1x8x8xf32>, vector<1x1x8x8xf32> -> vector<1x4x8x8xf32>
    %37 = vector.shape_cast %36 : vector<1x4x8x8xf32> to vector<4x8x8xf32>
    %38 = arith.truncf %37 : vector<4x8x8xf32> to vector<4x8x8xbf16>
    "tpu.trace_start"() <{level = 10 : i32, message = "bnd,bmd->bnm"}> : () -> ()
    %cst_7 = arith.constant dense<0.000000e+00> : vector<4x8x8xf32>
    %39 = tpu.matmul %16, %27, %cst_7 {dimension_numbers = #tpu.dot_dimension_numbers<[2], [2], [1], [1], [0, 0, 0, 1, 1, 1], [0], [0]>} : vector<4x8x8xbf16>, vector<4x8x8xbf16>, vector<4x8x8xf32> -> vector<4x8x8xf32>
    "tpu.trace_stop"() : () -> ()
    %cst_8 = arith.constant dense<0xFF800000> : vector<4x8xf32>
    %40 = vector.multi_reduction <maximumf>, %39, %cst_8 [2] : vector<4x8x8xf32> to vector<4x8xf32>
    %41 = vector.shape_cast %40 : vector<4x8xf32> to vector<4x8x1xf32>
    %42 = vector.broadcast %41 : vector<4x8x1xf32> to vector<4x8x8xf32>
    %43 = arith.subf %39, %42 : vector<4x8x8xf32>
    %44 = math.exp %43 : vector<4x8x8xf32>
    %cst_9 = arith.constant dense<0.000000e+00> : vector<4x8xf32>
    %45 = vector.multi_reduction <add>, %44, %cst_9 [2] : vector<4x8x8xf32> to vector<4x8xf32>
    %46 = vector.shape_cast %45 : vector<4x8xf32> to vector<4x8x1xf32>
    %47 = tpu.reciprocal %46 {approx = true} : vector<4x8x1xf32> -> vector<4x8x1xf32>
    %48 = vector.broadcast %47 : vector<4x8x1xf32> to vector<4x8x8xf32>
    %49 = arith.mulf %44, %48 : vector<4x8x8xf32>
    %50 = arith.truncf %49 : vector<4x8x8xf32> to vector<4x8x8xbf16>
    "tpu.trace_start"() <{level = 10 : i32, message = "bnm,bmd->bnd"}> : () -> ()
    %cst_10 = arith.constant dense<0.000000e+00> : vector<4x8x8xf32>
    %51 = tpu.matmul %50, %38, %cst_10 {dimension_numbers = #tpu.dot_dimension_numbers<[2], [1], [1], [2], [0, 0, 0, 1, 1, 2], [0], [0]>} : vector<4x8x8xbf16>, vector<4x8x8xbf16>, vector<4x8x8xf32> -> vector<4x8x8xf32>
    "tpu.trace_stop"() : () -> ()
    %52 = vector.shape_cast %51 : vector<4x8x8xf32> to vector<1x4x8x8xf32>
    %53 = vector.extract_strided_slice %52 {offsets = [0, 0, 0, 0], sizes = [1, 1, 8, 8], strides = [1, 1, 1, 1]} : vector<1x4x8x8xf32> to vector<1x1x8x8xf32>
    %54 = vector.shape_cast %53 : vector<1x1x8x8xf32> to vector<1x8x8xf32>
    %55 = vector.extract_strided_slice %52 {offsets = [0, 1, 0, 0], sizes = [1, 1, 8, 8], strides = [1, 1, 1, 1]} : vector<1x4x8x8xf32> to vector<1x1x8x8xf32>
    %56 = vector.shape_cast %55 : vector<1x1x8x8xf32> to vector<1x8x8xf32>
    %57 = vector.extract_strided_slice %52 {offsets = [0, 2, 0, 0], sizes = [1, 1, 8, 8], strides = [1, 1, 1, 1]} : vector<1x4x8x8xf32> to vector<1x1x8x8xf32>
    %58 = vector.shape_cast %57 : vector<1x1x8x8xf32> to vector<1x8x8xf32>
    %59 = vector.extract_strided_slice %52 {offsets = [0, 3, 0, 0], sizes = [1, 1, 8, 8], strides = [1, 1, 1, 1]} : vector<1x4x8x8xf32> to vector<1x1x8x8xf32>
    %60 = vector.shape_cast %59 : vector<1x1x8x8xf32> to vector<1x8x8xf32>
    %61 = tpu.concatenate %54, %56, %58, %60 in 2 : vector<1x8x8xf32>, vector<1x8x8xf32>, vector<1x8x8xf32>, vector<1x8x8xf32> -> vector<1x8x32xf32>
    %62 = vector.shape_cast %61 : vector<1x8x32xf32> to vector<8x32xf32>
    %63 = arith.truncf %62 : vector<8x32xf32> to vector<8x32xbf16>
    %c0_11 = arith.constant 0 : index
    %c0_12 = arith.constant 0 : index
    %64 = vector.load %arg3[%c0_11, %c0_12] : memref<32x32xbf16, #tpu.memory_space<vmem>>, vector<32x32xbf16>
    %cst_13 = arith.constant dense<0.000000e+00> : vector<8x32xf32>
    %65 = tpu.matmul %63, %64, %cst_13 {dimension_numbers = #tpu.dot_dimension_numbers<[1], [0], [0], [1], [0, 0, 1, 1], [], []>} : vector<8x32xbf16>, vector<32x32xbf16>, vector<8x32xf32> -> vector<8x32xf32>
    %c0_14 = arith.constant 0 : index
    %c0_15 = arith.constant 0 : index
    %66 = vector.load %arg4[%c0_14, %c0_15] : memref<1x32xf32, #tpu.memory_space<vmem>>, vector<1x32xf32>
    %67 = vector.broadcast %66 : vector<1x32xf32> to vector<8x32xf32>
    %68 = arith.addf %65, %67 : vector<8x32xf32>
    %69 = vector.shape_cast %68 : vector<8x32xf32> to vector<1x8x32xf32>
    %cst_16 = arith.constant 0.899999976 : f32
    %70 = vector.broadcast %cst_16 : f32 to vector<1x8x32xf32>
    %71 = arith.mulf %70, %0 : vector<1x8x32xf32>
    %72 = arith.addf %69, %71 : vector<1x8x32xf32>
    %c0_17 = arith.constant 0 : index
    %c0_18 = arith.constant 0 : index
    %73 = vector.load %arg9[%c0_17, %c0_18] : memref<1x32xf32, #tpu.memory_space<vmem>>, vector<1x32xf32>
    %c0_19 = arith.constant 0 : index
    %c0_20 = arith.constant 0 : index
    %74 = vector.load %arg10[%c0_19, %c0_20] : memref<1x32xf32, #tpu.memory_space<vmem>>, vector<1x32xf32>
    %cst_21 = arith.constant dense<0.000000e+00> : vector<1x8xf32>
    %75 = vector.multi_reduction <add>, %72, %cst_21 [2] : vector<1x8x32xf32> to vector<1x8xf32>
    %76 = vector.shape_cast %75 : vector<1x8xf32> to vector<1x8x1xf32>
    %cst_22 = arith.constant 3.200000e+01 : f32
    %77 = vector.broadcast %cst_22 : f32 to vector<1x8x1xf32>
    %78 = arith.divf %76, %77 : vector<1x8x1xf32>
    %79 = vector.broadcast %78 : vector<1x8x1xf32> to vector<1x8x32xf32>
    %80 = arith.subf %72, %79 : vector<1x8x32xf32>
    %81 = arith.mulf %80, %80 : vector<1x8x32xf32>
    %cst_23 = arith.constant dense<0.000000e+00> : vector<1x8xf32>
    %82 = vector.multi_reduction <add>, %81, %cst_23 [2] : vector<1x8x32xf32> to vector<1x8xf32>
    %83 = vector.shape_cast %82 : vector<1x8xf32> to vector<1x8x1xf32>
    %cst_24 = arith.constant 3.200000e+01 : f32
    %84 = vector.broadcast %cst_24 : f32 to vector<1x8x1xf32>
    %85 = arith.divf %83, %84 : vector<1x8x1xf32>
    %cst_25 = arith.constant 9.99999974E-6 : f32
    %86 = vector.broadcast %cst_25 : f32 to vector<1x8x1xf32>
    %87 = arith.addf %85, %86 : vector<1x8x1xf32>
    %88 = math.rsqrt %87 : vector<1x8x1xf32>
    %89 = vector.broadcast %88 : vector<1x8x1xf32> to vector<1x8x32xf32>
    %90 = arith.mulf %80, %89 : vector<1x8x32xf32>
    %91 = vector.shape_cast %73 : vector<1x32xf32> to vector<1x1x32xf32>
    %92 = vector.broadcast %91 : vector<1x1x32xf32> to vector<1x8x32xf32>
    %93 = arith.mulf %90, %92 : vector<1x8x32xf32>
    %94 = vector.shape_cast %74 : vector<1x32xf32> to vector<1x1x32xf32>
    %95 = vector.broadcast %94 : vector<1x1x32xf32> to vector<1x8x32xf32>
    %96 = arith.addf %93, %95 : vector<1x8x32xf32>
    %97 = vector.shape_cast %96 : vector<1x8x32xf32> to vector<8x32xf32>
    %98 = arith.truncf %97 : vector<8x32xf32> to vector<8x32xbf16>
    %c0_26 = arith.constant 0 : index
    %c0_27 = arith.constant 0 : index
    %99 = vector.load %arg5[%c0_26, %c0_27] : memref<32x64xbf16, #tpu.memory_space<vmem>>, vector<32x64xbf16>
    %cst_28 = arith.constant dense<0.000000e+00> : vector<8x64xf32>
    %100 = tpu.matmul %98, %99, %cst_28 {dimension_numbers = #tpu.dot_dimension_numbers<[1], [0], [0], [1], [0, 0, 1, 1], [], []>} : vector<8x32xbf16>, vector<32x64xbf16>, vector<8x64xf32> -> vector<8x64xf32>
    %c0_29 = arith.constant 0 : index
    %c0_30 = arith.constant 0 : index
    %101 = vector.load %arg6[%c0_29, %c0_30] : memref<1x64xf32, #tpu.memory_space<vmem>>, vector<1x64xf32>
    %102 = vector.broadcast %101 : vector<1x64xf32> to vector<8x64xf32>
    %103 = arith.addf %100, %102 : vector<8x64xf32>
    %cst_31 = arith.constant 0.000000e+00 : f32
    %104 = vector.broadcast %cst_31 : f32 to vector<8x64xf32>
    %105 = arith.maximumf %103, %104 : vector<8x64xf32>
    %106 = arith.truncf %105 : vector<8x64xf32> to vector<8x64xbf16>
    %c0_32 = arith.constant 0 : index
    %c0_33 = arith.constant 0 : index
    %107 = vector.load %arg7[%c0_32, %c0_33] : memref<64x32xbf16, #tpu.memory_space<vmem>>, vector<64x32xbf16>
    %cst_34 = arith.constant dense<0.000000e+00> : vector<8x32xf32>
    %108 = tpu.matmul %106, %107, %cst_34 {dimension_numbers = #tpu.dot_dimension_numbers<[1], [0], [0], [1], [0, 0, 1, 1], [], []>} : vector<8x64xbf16>, vector<64x32xbf16>, vector<8x32xf32> -> vector<8x32xf32>
    %c0_35 = arith.constant 0 : index
    %c0_36 = arith.constant 0 : index
    %109 = vector.load %arg8[%c0_35, %c0_36] : memref<1x32xf32, #tpu.memory_space<vmem>>, vector<1x32xf32>
    %110 = vector.broadcast %109 : vector<1x32xf32> to vector<8x32xf32>
    %111 = arith.addf %108, %110 : vector<8x32xf32>
    %112 = vector.shape_cast %111 : vector<8x32xf32> to vector<1x8x32xf32>
    %cst_37 = arith.constant 0.899999976 : f32
    %113 = vector.broadcast %cst_37 : f32 to vector<1x8x32xf32>
    %114 = arith.mulf %113, %96 : vector<1x8x32xf32>
    %115 = arith.addf %112, %114 : vector<1x8x32xf32>
    %c0_38 = arith.constant 0 : index
    %c0_39 = arith.constant 0 : index
    %116 = vector.load %arg11[%c0_38, %c0_39] : memref<1x32xf32, #tpu.memory_space<vmem>>, vector<1x32xf32>
    %c0_40 = arith.constant 0 : index
    %c0_41 = arith.constant 0 : index
    %117 = vector.load %arg12[%c0_40, %c0_41] : memref<1x32xf32, #tpu.memory_space<vmem>>, vector<1x32xf32>
    %cst_42 = arith.constant dense<0.000000e+00> : vector<1x8xf32>
    %118 = vector.multi_reduction <add>, %115, %cst_42 [2] : vector<1x8x32xf32> to vector<1x8xf32>
    %119 = vector.shape_cast %118 : vector<1x8xf32> to vector<1x8x1xf32>
    %cst_43 = arith.constant 3.200000e+01 : f32
    %120 = vector.broadcast %cst_43 : f32 to vector<1x8x1xf32>
    %121 = arith.divf %119, %120 : vector<1x8x1xf32>
    %122 = vector.broadcast %121 : vector<1x8x1xf32> to vector<1x8x32xf32>
    %123 = arith.subf %115, %122 : vector<1x8x32xf32>
    %124 = arith.mulf %123, %123 : vector<1x8x32xf32>
    %cst_44 = arith.constant dense<0.000000e+00> : vector<1x8xf32>
    %125 = vector.multi_reduction <add>, %124, %cst_44 [2] : vector<1x8x32xf32> to vector<1x8xf32>
    %126 = vector.shape_cast %125 : vector<1x8xf32> to vector<1x8x1xf32>
    %cst_45 = arith.constant 3.200000e+01 : f32
    %127 = vector.broadcast %cst_45 : f32 to vector<1x8x1xf32>
    %128 = arith.divf %126, %127 : vector<1x8x1xf32>
    %cst_46 = arith.constant 9.99999974E-6 : f32
    %129 = vector.broadcast %cst_46 : f32 to vector<1x8x1xf32>
    %130 = arith.addf %128, %129 : vector<1x8x1xf32>
    %131 = math.rsqrt %130 : vector<1x8x1xf32>
    %132 = vector.broadcast %131 : vector<1x8x1xf32> to vector<1x8x32xf32>
    %133 = arith.mulf %123, %132 : vector<1x8x32xf32>
    %134 = vector.shape_cast %116 : vector<1x32xf32> to vector<1x1x32xf32>
    %135 = vector.broadcast %134 : vector<1x1x32xf32> to vector<1x8x32xf32>
    %136 = arith.mulf %133, %135 : vector<1x8x32xf32>
    %137 = vector.shape_cast %117 : vector<1x32xf32> to vector<1x1x32xf32>
    %138 = vector.broadcast %137 : vector<1x1x32xf32> to vector<1x8x32xf32>
    %139 = arith.addf %136, %138 : vector<1x8x32xf32>
    %c0_47 = arith.constant 0 : index
    %c0_48 = arith.constant 0 : index
    %c0_49 = arith.constant 0 : index
    %140 = vector.load %arg13[%c0_47, %c0_48, %c0_49] : memref<1x8x32xf32, #tpu.memory_space<vmem>>, vector<1x8x32xf32>
    tpu.vector_store %arg13[%c0_47, %c0_48, %c0_49], %139 {strides = array<i32>} : memref<1x8x32xf32, #tpu.memory_space<vmem>>, vector<1x8x32xf32>,
    return
  }
  func.func @transform_0(%arg0: i32) -> (i32, i32, i32) {
    %c0_i32 = arith.constant 0 : i32
    %c0_i32_0 = arith.constant 0 : i32
    %c0_i32_1 = arith.constant 0 : i32
    return %arg0, %c0_i32, %c0_i32_0 : i32, i32, i32
  }
  func.func @transform_1(%arg0: i32) -> (i32, i32) {
    %c0_i32 = arith.constant 0 : i32
    %c0_i32_0 = arith.constant 0 : i32
    %c0_i32_1 = arith.constant 0 : i32
    return %c0_i32, %c0_i32_0 : i32, i32
  }
  func.func @transform_2(%arg0: i32) -> (i32, i32) {
    %c0_i32 = arith.constant 0 : i32
    %c0_i32_0 = arith.constant 0 : i32
    %c0_i32_1 = arith.constant 0 : i32
    return %c0_i32, %c0_i32_0 : i32, i32
  }
  func.func @transform_3(%arg0: i32) -> (i32, i32) {
    %c0_i32 = arith.constant 0 : i32
    %c0_i32_0 = arith.constant 0 : i32
    %c0_i32_1 = arith.constant 0 : i32
    return %c0_i32, %c0_i32_0 : i32, i32
  }
  func.func @transform_4(%arg0: i32) -> (i32, i32) {
    %c0_i32 = arith.constant 0 : i32
    %c0_i32_0 = arith.constant 0 : i32
    %c0_i32_1 = arith.constant 0 : i32
    return %c0_i32, %c0_i32_0 : i32, i32
  }
  func.func @transform_5(%arg0: i32) -> (i32, i32) {
    %c0_i32 = arith.constant 0 : i32
    %c0_i32_0 = arith.constant 0 : i32
    %c0_i32_1 = arith.constant 0 : i32
    return %c0_i32, %c0_i32_0 : i32, i32
  }
  func.func @transform_6(%arg0: i32) -> (i32, i32) {
    %c0_i32 = arith.constant 0 : i32
    %c0_i32_0 = arith.constant 0 : i32
    %c0_i32_1 = arith.constant 0 : i32
    return %c0_i32, %c0_i32_0 : i32, i32
  }
  func.func @transform_7(%arg0: i32) -> (i32, i32) {
    %c0_i32 = arith.constant 0 : i32
    %c0_i32_0 = arith.constant 0 : i32
    %c0_i32_1 = arith.constant 0 : i32
    return %c0_i32, %c0_i32_0 : i32, i32
  }
  func.func @transform_8(%arg0: i32) -> (i32, i32) {
    %c0_i32 = arith.constant 0 : i32
    %c0_i32_0 = arith.constant 0 : i32
    %c0_i32_1 = arith.constant 0 : i32
    return %c0_i32, %c0_i32_0 : i32, i32
  }
  func.func @transform_9(%arg0: i32) -> (i32, i32) {
    %c0_i32 = arith.constant 0 : i32
    %c0_i32_0 = arith.constant 0 : i32
    %c0_i32_1 = arith.constant 0 : i32
    return %c0_i32, %c0_i32_0 : i32, i32
  }
  func.func @transform_10(%arg0: i32) -> (i32, i32) {
    %c0_i32 = arith.constant 0 : i32
    %c0_i32_0 = arith.constant 0 : i32
    %c0_i32_1 = arith.constant 0 : i32
    return %c0_i32, %c0_i32_0 : i32, i32
  }
  func.func @transform_11(%arg0: i32) -> (i32, i32) {
    %c0_i32 = arith.constant 0 : i32
    %c0_i32_0 = arith.constant 0 : i32
    %c0_i32_1 = arith.constant 0 : i32
    return %c0_i32, %c0_i32_0 : i32, i32
  }
  func.func @transform_12(%arg0: i32) -> (i32, i32, i32) {
    %c0_i32 = arith.constant 0 : i32
    %c0_i32_0 = arith.constant 0 : i32
    %c0_i32_1 = arith.constant 0 : i32
    return %arg0, %c0_i32, %c0_i32_0 : i32, i32, i32
  }
}

</mosaic_0001>

<bundles_post_ra>
// kernel: tpu_custom_call.1
= control target key start
LH: loop header
LB: loop body
LE: loop exit
PB: predicated region body
PF: predicated region fallthrough
CT: control target
= control target key end

     0   :  { %s1991_s0 = inlined_call_operand.vmem [shape: f32[2,8,32], index: 0, kind: input, shape index: {}]   ;;  %s1992_s1 = inlined_call_operand.vmem [shape: bf16[32,96], index: 1, kind: input, shape index: {}]   ;;  %s1993_s2 = inlined_call_operand.vmem [shape: bf16[32,32], index: 2, kind: input, shape index: {}]   ;;  %s1994_s3 = inlined_call_operand.vmem [shape: f32[1,32], index: 3, kind: input, shape index: {}]   ;;  %s1995_s4 = inlined_call_operand.hbm [shape: bf16[32,64], index: 4, kind: input, shape index: {}]   ;;  %s1996_s5 = inlined_call_operand.vmem [shape: f32[1,64], index: 5, kind: input, shape index: {}]   ;;  %s1997_s6 = inlined_call_operand.vmem [shape: bf16[64,32], index: 6, kind: input, shape index: {}]   ;;  %s1998_s7 = inlined_call_operand.vmem [shape: f32[1,32], index: 7, kind: input, shape index: {}]   ;;  %s1999_s8 = inlined_call_operand.vmem [shape: f32[1,32], index: 8, kind: input, shape index: {}]   ;;  %s2000_s9 = inlined_call_operand.vmem [shape: f32[1,32], index: 9, kind: input, shape index: {}]   ;;  %s2001_s10 = inlined_call_operand.vmem [shape: f32[1,32], index: 10, kind: input, shape index: {}]   ;;  %s2002_s11 = inlined_call_operand.vmem [shape: f32[1,32], index: 11, kind: input, shape index: {}]   ;;  %s2003_s12 = inlined_call_operand.hbm [shape: f32[2,8,32], index: 12, kind: output, shape index: {}]  }
   0x1   :  { %2004 = sst [smem:[#allocation8_spill]] %s1991_s0 }
   0x2   :  { %2005 = sst [smem:[#allocation9_spill]] %s1992_s1 }
   0x3   :  { %2006 = sst [smem:[#allocation10_spill]] %s1993_s2 }
   0x4   :  { %2007 = sst [smem:[#allocation11_spill]] %s1994_s3 }
   0x5   :  { %17 = vsyncpa [#allocation3], 0 }
   0x6   :  { %18 = vsyncpa [#allocation4], 0 }
   0x7   :  { %20 = vsyncpa [#allocation4 + $0x1], 0  ;;  %s1742_s21 = smov 0   ;;  %s1744_s22 = smov 0  }
   0x8   :  { %s1746_s23 = smov 0   ;;  %s1748_s24 = smov 0  }
   0x9 LB: > { %s1763_s25 = sadd.s32 4294967295, %s1661_s24   ;;  %s1324_s26 = sadd.s32 4294967294, %s1661_s24   ;;  %s1661_s24 = sphi %s1748_s24, %s2019_s24   ;;  %s1657_s23 = sphi %s1746_s23, %s2018_s23   ;;  %s1653_s22 = sphi %s1744_s22, %s2017_s22   ;;  %s1649_s21 = sphi %s1742_s21, %s2016_s21  }
   0xa   : > { %s1767_s27 = sadd.s32 1, %s1661_s24   ;;  %s290_s28 = sadd.s32 1, %s1657_s23 }
   0xb   : > { %s287_s29 = ssub.s32 %s1661_s24, %s1767_s27  ;;  %p300_p0 = scmp.ne.s32.totalorder %s1657_s23, %s1653_s22 }
   0xc   : > { %p288_p1 = scmp.eq.s32.totalorder %s287_s29, 0  ;;  %p301_p2 = scmp.eq.s32.totalorder %s1763_s25, 1 }
   0xd   : > { %p306_p3 = scmp.ne.s32.totalorder %s1653_s22, %s1649_s21  ;;  %p307_p4 = scmp.eq.s32.totalorder %s1324_s26, 1 }
   0xe   : > { %s1778_s30 = scalar_select %p288_p1, %s1657_s23, %s290_s28  }
   0xf   : > { %p1780_p5 = por %p301_p2, %p300_p0  ;;  %p1784_p6 = por %p307_p4, %p306_p3 }
  0x10   : > { %p1325_p7 = scmp.ge.s32.totalorder %s1661_s24, 1  ;;  %p314_p8 = scmp.lt.s32.totalorder %s1661_s24, 3 }
  0x11   : > { %s2009_s14 = scalar_select %p1784_p6, 1, 0 }
  0x12   : > { %p1493_p9 = scmp.eq.s32.totalorder %s1763_s25, 0  ;;  %p1791_p10 = pnand %p1325_p7, %p314_p8 }
  0x13   : > { %s1663_s16 = smov [#allocation2]  }
  0x14   : > { %s335_s17 = sshll.u32 %s1663_s16, 4  ;;  %p1485_p11 = pneg %p1791_p10  ;;  %s336_s17 = int_to_ptr.vmem [resolvable:$true] %s335_s17 }
  0x15   : > { %s1582_s18 = scalar_lea.vmem %s336_s17, 256  ;;  %p1590_p3 = scmp.lt.s32.totalorder %s336_s17, %s336_s17 }
  0x16   : > { %p1486_p12 = pnand %p1493_p9, %p1485_p11  ;;  %p1583_p0 = scmp.ne.s32.totalorder %s336_s17, %s1582_s18 }
  0x17   : > { %p1591_p4 = scmp.lt.s32.totalorder %s1582_s18, %s1582_s18 }
  0x18   : > { %p1573_p13 = pneg %p1486_p12 }
  0x19   : > { %p1592_p6 = por %p1591_p4, %p1590_p3 }
  0x1a   : > { %p1585_p1 = pnand %p1583_p0, %p1573_p13 }
  0x1c   : > { %p1586_p2 = pneg %p1585_p1 }
  0x1e   : > { %p1593_p7 = pnand %p1592_p6, %p1586_p2 }
  0x20   : > { %1596 = shalt.err (!%p1593_p7)
}
  0x21   : > { %s1664_s19 = smov 64   ;;  %s1665_s20 = smov 4  }
  0x22   : > { %1488 = dma.hbm_to_vmem [thread:$0]  (!%p1486_p12), %s1995_s4, 256, %s336_s17, [#allocation3], %s1664_s19, %s1664_s19, %s1665_s20  }
  0x23   : > { %379 = sbr.rel (%p1791_p10) target bundleno = 2539 (0x9eb), region = 68 }
  0x28   : > { %1640 = dma.done.wait (%p1493_p9), [#allocation3], 256  }
  0x29   : > { %1642 = vsyncadd (%p1493_p9), [#allocation3], 4294967040  ;;  %p420_p8 = scmp.lt.s32.totalorder %s1763_s25, 1  ;;  %v1666_v0 = vmov 0.0   ;;  %vm1667_vm0 = vmmov 0   ;;  %s2011_s0 = sld [smem:[#allocation8_spill]] }
  0x2a   : > { %1395 = vmatprep.subr.bf16.mxu0 %v1666_v0  ;;  %1399 = vmatprep.mubr.msk.bf16.mxu0 %vm1667_vm0, %v1666_v0  ;;  %s2012_s1 = sld [smem:[#allocation9_spill]]  ;;  %vm443_vm1 = vcmask 261120   ;;  %s1670_s16 = smov 112   ;;  %vm504_vm2 = vcmask 64512   ;;  %vm751_vm3 = vcmask 1043456   ;;  %vm952_vm4 = vcmask 130048  }
  0x2b   : > { %s421_s29 = scalar_select %p420_p8, %s1763_s25, 1  ;;  %1403 = vmatprep.subr.bf16.mxu1 %v1666_v0  ;;  %1405 = vmatprep.mubr.msk.bf16.mxu1 %vm1667_vm0, %v1666_v0  ;;  %vm954_vm5 = vcmask 195584   ;;  %vm1163_vm6 = vcmask 523264  }
  0x2c   : > { %s1671_s17 = smov 96   ;;  %s2013_s2 = sld [smem:[#allocation10_spill]] }
  0x2d   : > { %s1331_s15 = sshll.u32 %s421_s29, 3  ;;  %s1668_s29 = smov 104  }
  0x2e   : > { %s2014_s3 = sld [smem:[#allocation11_spill]]  ;;  %s1676_s20 = smov [#allocation5]  }
  0x2f   : > { %s423_s18 = scalar_lea.vmem %s2011_s0, %s1331_s15  ;;  %s1669_s15 = smov 120  }
  0x30   : > { %v1541_v1 = vld [vmem:[%s2012_s1 + $0x8] sm:$0xff]   ;;  %v1542_v2 = vld [vmem:[%s2012_s1] sm:$0xff]   ;;  %s1601_s26 = sshll.u32 %s1676_s20, 4  ;;  %s1602_s26 = int_to_ptr.vmem [resolvable:$false] %s1601_s26 }
  0x31   : > { %1396 = vmatpush3.bf16.msra.mxu0 %v1541_v1  ;;  %v1825_v3 = vld [vmem:[%s423_s18] sm:$0xff]  ;;  %s1672_s18 = smov 64  }
  0x32   : > { %1397 = vmatprep.subr.bf16.mxu0 %v1666_v0  ;;  %v426_v4 = vpack.c.bf16 %v1825_v3, %v1825_v3 }
  0x35   : > { %1398 = vmatpush3.bf16.msra.mxu0 %v1542_v2 }
  0x36   : > { %1409 = vmatprep.subr.bf16.mxu0 %v1666_v0 }
  0x38   : > { %1400 = vmatmul.mubr.msk.bf16.vlgmr.msra.gmra.mxu0 %vm443_vm1, %v426_v4 }
  0x39   : > { %1411 = vmatprep.mubr.msk.bf16.mxu0 %vm1667_vm0, %v1666_v0 }
  0xf8   : > { %v481_v5 = vpop.f32.mrf.mxu0 }
  0xf9   : > { %494 = vrot.lane.b32.xlu1 %v481_v5, %s1668_s29  ;;  %488 = vrot.lane.b32.xlu0 %v481_v5, %s1669_s15  ;;  %v1834_v7 = vpack.c.bf16 %v481_v5, %v481_v5  ;;  %s1673_s29 = smov 8   ;;  %s1674_s15 = smov 16  }
  0xfa   : > { %v1401_v6 = vpop.f32.mrf.mxu0 }
  0xfc   : > { %v484_v8 = vpop.f32.mrf.mxu0 }
  0xfd   : > { %491 = vrot.lane.b32.xlu0 %v481_v5, %s1670_s16  ;;  %502 = vrot.lane.b32.xlu1 %v1834_v7, %s1671_s17  ;;  %s1675_s16 = smov 24  }
  0xfe   : > { %v1402_v9 = vpop.f32.mrf.mxu0 }
 0x16b   : > { %v495_v10 = vpop.permute.xlu1 %494  ;;  %v489_v11 = vpop.permute.xlu0 %488 }
 0x16c   : > { %v498_v12 = vpack.c.bf16 %v489_v11, %v489_v11  ;;  %v1837_v15 = vpack.c.bf16 %v495_v10, %v495_v10 }
 0x16e   : > { %552 = vrot.lane.b32.xlu0 %v498_v12, %s1671_s17 }
 0x16f   : > { %v492_v13 = vpop.permute.xlu0 %491  ;;  %v503_v14 = vpop.permute.xlu1 %502 }
 0x170   : > { %v1839_v16 = vpack.c.bf16 %v492_v13, %v492_v13  ;;  %v509_v17 = vsel %vm504_vm2, %v503_v14, 0 }
 0x171   : > { %1404 = vmatpush3.bf16.xpose.msra.mxu1 %v509_v17 }
 0x172   : > { %650 = vrot.lane.b32.xlu0 %v1837_v15, %s1671_s17  ;;  %601 = vrot.lane.b32.xlu1 %v1839_v16, %s1671_s17  ;;  %s417_s17 = sand.u32 1, %s1653_s22  }
 0x173   : > { %1415 = vmatprep.subr.bf16.mxu1 %v1666_v0 }
 0x178   : > { %1406 = vmatmul.mubr.msk.bf16.vlgmr.msra.gmra.mxu1 %vm504_vm2, %v1834_v7 }
 0x179   : > { %1417 = vmatprep.mubr.msk.bf16.mxu1 %vm1667_vm0, %v1666_v0 }
 0x1e0   : > { %v553_v18 = vpop.permute.xlu0 %552 }
 0x1e1   : > { %v558_v19 = vsel %vm504_vm2, %v553_v18, 0 }
 0x1e2   : > { %1410 = vmatpush3.bf16.xpose.msra.mxu0 %v558_v19 }
 0x1e3   : > { %1421 = vmatprep.subr.bf16.mxu0 %v1666_v0 }
 0x1e4   : > { %v602_v20 = vpop.permute.xlu1 %601  ;;  %v651_v22 = vpop.permute.xlu0 %650 }
 0x1e5   : > { %v607_v21 = vsel %vm504_vm2, %v602_v20, 0  ;;  %v656_v23 = vsel %vm504_vm2, %v651_v22, 0 }
 0x1e6   : > { %1416 = vmatpush3.bf16.xpose.msra.mxu1 %v607_v21 }
 0x1e7   : > { %1427 = vmatprep.subr.bf16.mxu1 %v1666_v0 }
 0x1e9   : > { %1412 = vmatmul.mubr.msk.bf16.vlgmr.msra.gmra.mxu0 %vm504_vm2, %v498_v12 }
 0x1ea   : > { %1422 = vmatpush3.bf16.xpose.msra.mxu0 %v656_v23  ;;  %1423 = vmatprep.mubr.msk.bf16.mxu0 %vm1667_vm0, %v1666_v0 }
 0x1eb   : > { %1433 = vmatprep.subr.bf16.mxu0 %v1666_v0 }
 0x1ed   : > { %1418 = vmatmul.mubr.msk.bf16.vlgmr.msra.gmra.mxu1 %vm504_vm2, %v1839_v16 }
 0x1ee   : > { %1429 = vmatprep.mubr.msk.bf16.mxu1 %vm1667_vm0, %v1666_v0 }
 0x1f1   : > { %1424 = vmatmul.mubr.msk.bf16.vlgmr.msra.gmra.mxu0 %vm504_vm2, %v1837_v15 }
 0x1f2   : > { %1435 = vmatprep.mubr.msk.bf16.mxu0 %vm1667_vm0, %v1666_v0 }
 0x238   : > { %v545_v24 = vpop.f32.mrf.mxu1 }
 0x239   : > { %v698_v25 = vsel %vm504_vm2, %v545_v24, -inf }
 0x23a   : > { %699 = vmax.xlane.f32.xlu1 %v698_v25  ;;  %v1407_v26 = vpop.f32.mrf.mxu1 }
 0x23c   : > { %v548_v27 = vpop.f32.mrf.mxu1 }
 0x23e   : > { %v1408_v28 = vpop.f32.mrf.mxu1 }
 0x2a9   : > { %v594_v29 = vpop.f32.mrf.mxu0 }
 0x2aa   : > { %v701_v30 = vsel %vm504_vm2, %v594_v29, -inf }
 0x2ab   : > { %702 = vmax.xlane.f32.xlu0 %v701_v30  ;;  %v1413_v31 = vpop.f32.mrf.mxu0  ;;  %v1543_v30 = vld [vmem:[%s2013_s2 + $0x8] sm:$0xff]  }
 0x2ac   : > { %v1544_v31 = vld [vmem:[%s2013_s2] sm:$0xff]  }
 0x2ad   : > { %v597_v32 = vpop.f32.mrf.mxu0  ;;  %v643_v33 = vpop.f32.mrf.mxu1 }
 0x2ae   : > { %v704_v34 = vsel %vm504_vm2, %v643_v33, -inf }
 0x2af   : > { %v1419_v35 = vpop.f32.mrf.mxu1  ;;  %705 = vmax.xlane.f32.xlu0 %v704_v34  ;;  %v1414_v36 = vpop.f32.mrf.mxu0 }
 0x2b1   : > { %v646_v37 = vpop.f32.mrf.mxu1  ;;  %v692_v38 = vpop.f32.mrf.mxu0 }
 0x2b2   : > { %v707_v39 = vsel %vm504_vm2, %v692_v38, -inf }
 0x2b3   : > { %v1420_v40 = vpop.f32.mrf.mxu1  ;;  %708 = vmax.xlane.f32.xlu1 %v707_v39  ;;  %v1425_v41 = vpop.f32.mrf.mxu0 }
 0x2b5   : > { %v695_v42 = vpop.f32.mrf.mxu0 }
 0x2b7   : > { %v1426_v43 = vpop.f32.mrf.mxu0 }
 0x2c3   : > { %v700_v44 = vpop.xlane.xlu1 %699 }
 0x2c4   : > { %795 = vrot.lane.b32.xlu1 %v498_v12, %s1672_s18  ;;  %v710_v45 = vsub.f32 %v545_v24, %v700_v44 }
 0x2c5   : > { %746 = vrot.lane.b32.xlu0 %v1834_v7, %s1672_s18 }
 0x2c6   : > { %v714_v46 = vmul.f32 1.442695, %v710_v45 }
 0x2c8   : > { %1551 = vpow2.f32 %v714_v46 }
 0x2d5   : > { %v1552_v47 = vpop.eup %1551 }
 0x2d6   : > { %v722_v48 = vsel %vm504_vm2, %v1552_v47, 0.0 }
 0x2e4   : > { %723 = vadd.xlane.f32.xlu0 %v722_v48 }
 0x334   : > { %v703_v49 = vpop.xlane.xlu0 %702 }
 0x335   : > { %v711_v50 = vsub.f32 %v594_v29, %v703_v49 }
 0x337   : > { %v716_v51 = vmul.f32 1.442695, %v711_v50 }
 0x338   : > { %v706_v52 = vpop.xlane.xlu0 %705 }
 0x339   : > { %1553 = vpow2.f32 %v716_v51  ;;  %v712_v53 = vsub.f32 %v643_v33, %v706_v52  ;;  %v1343_v51 = vld [vmem:[%s2014_s3] ss:$0 sm:$0xff]  ;;  %v1023_v52 = vmul.f32 0.9, %v1825_v3  ;;  %v1547_v3 = vld [vmem:[%s1997_s6 + $0x18] sm:$0xff]   ;;  %s1240_s3 = scalar_lea.sflag [#allocation4], %s417_s17 }
 0x33b   : > { %v718_v54 = vmul.f32 1.442695, %v712_v53 }
 0x33c   : > { %v747_v55 = vpop.permute.xlu0 %746  ;;  %v709_v56 = vpop.xlane.xlu1 %708 }
 0x33d   : > { %1555 = vpow2.f32 %v718_v54  ;;  %v753_v57 = vsel %vm751_vm3, %v747_v55, 0  ;;  %v713_v58 = vsub.f32 %v692_v38, %v709_v56 }
 0x33e   : > { %1428 = vmatpush3.bf16.msra.mxu1 %v753_v57 }
 0x33f   : > { %v720_v59 = vmul.f32 1.442695, %v713_v58  ;;  %1439 = vmatprep.subr.bf16.mxu1 %v1666_v0 }
 0x340   : > { %v796_v60 = vpop.permute.xlu1 %795 }
 0x341   : > { %1557 = vpow2.f32 %v720_v59  ;;  %v801_v61 = vsel %vm751_vm3, %v796_v60, 0 }
 0x342   : > { %1434 = vmatpush3.bf16.msra.mxu0 %v801_v61 }
 0x343   : > { %1445 = vmatprep.subr.bf16.mxu0 %v1666_v0 }
 0x346   : > { %v1554_v62 = vpop.eup %1553 }
 0x347   : > { %v725_v63 = vsel %vm504_vm2, %v1554_v62, 0.0 }
 0x348   : > { %726 = vadd.xlane.f32.xlu1 %v725_v63 }
 0x34a   : > { %v1556_v1 = vpop.eup %1555 }
 0x34b   : > { %v728_v2 = vsel %vm504_vm2, %v1556_v1, 0.0 }
 0x34c   : > { %729 = vadd.xlane.f32.xlu0 %v728_v2  ;;  %v1545_v2 = vld [vmem:[#allocation2 + $0x8] sm:$0xff]  }
 0x34e   : > { %v1558_v4 = vpop.eup %1557 }
 0x34f   : > { %v731_v5 = vsel %vm504_vm2, %v1558_v4, 0.0 }
 0x350   : > { %732 = vadd.xlane.f32.xlu1 %v731_v5  ;;  %v1548_v5 = vld [vmem:[%s1997_s6 + $0x10] sm:$0xff]  }
 0x361   : > { %843 = vrot.lane.b32.xlu1 %v1839_v16, %s1672_s18 }
 0x362   : > { %891 = vrot.lane.b32.xlu0 %v1837_v15, %s1672_s18  ;;  %s1330_s18 = sshll.u32 %s417_s17, 3 }
 0x36d   : > { %v724_v6 = vpop.xlane.xlu0 %723 }
 0x36e   : > { %1559 = vrcp.f32 %v724_v6 }
 0x37b   : > { %v1560_v7 = vpop.eup %1559 }
 0x37c   : > { %v738_v8 = vmul.f32 %v1560_v7, %v1552_v47 }
 0x37e   : > { %v742_v9 = vpack.c.bf16 %v738_v8, %v738_v8 }
 0x380   : > { %1430 = vmatmul.mubr.msk.bf16.vlgmr.msra.gmra.mxu1 %vm504_vm2, %v742_v9 }
 0x381   : > { %1441 = vmatprep.mubr.msk.bf16.mxu1 %vm1667_vm0, %v1666_v0 }
 0x3d1   : > { %v727_v10 = vpop.xlane.xlu1 %726 }
 0x3d2   : > { %1561 = vrcp.f32 %v727_v10  ;;  %v1347_v10 = vld [vmem:[%s1999_s8] ss:$0 sm:$0xff] }
 0x3d5   : > { %v730_v11 = vpop.xlane.xlu0 %729 }
 0x3d6   : > { %1563 = vrcp.f32 %v730_v11 }
 0x3d9   : > { %v733_v12 = vpop.xlane.xlu1 %732  ;;  %v892_v17 = vpop.permute.xlu0 %891 }
 0x3da   : > { %1565 = vrcp.f32 %v733_v12  ;;  %v897_v20 = vsel %vm751_vm3, %v892_v17, 0  ;;  %v1348_v12 = vld [vmem:[%s2000_s9] ss:$0 sm:$0xff] }
 0x3db   : > { %v1550_v17 = vld [vmem:[%s1997_s6] sm:$0xff]  }
 0x3dd   : > { %v844_v13 = vpop.permute.xlu1 %843 }
 0x3de   : > { %v849_v14 = vsel %vm751_vm3, %v844_v13, 0 }
 0x3df   : > { %v1562_v15 = vpop.eup %1561  ;;  %1440 = vmatpush3.bf16.msra.mxu1 %v849_v14 }
 0x3e0   : > { %v739_v16 = vmul.f32 %v1562_v15, %v1554_v62  ;;  %1451 = vmatprep.subr.bf16.mxu1 %v1666_v0 }
 0x3e2   : > { %v743_v18 = vpack.c.bf16 %v739_v16, %v739_v16  ;;  %v1549_v16 = vld [vmem:[%s1997_s6 + $0x8] sm:$0xff]  }
 0x3e3   : > { %v1564_v19 = vpop.eup %1563 }
 0x3e4   : > { %1436 = vmatmul.mubr.msk.bf16.vlgmr.msra.gmra.mxu0 %vm504_vm2, %v743_v18  ;;  %v740_v21 = vmul.f32 %v1564_v19, %v1556_v1  ;;  %v1349_v18 = vld [vmem:[%s1996_s5] ss:$0 sm:$0xff] }
 0x3e5   : > { %1446 = vmatpush3.bf16.msra.mxu0 %v897_v20  ;;  %1447 = vmatprep.mubr.msk.bf16.mxu0 %vm1667_vm0, %v1666_v0 }
 0x3e6   : > { %v744_v22 = vpack.c.bf16 %v740_v21, %v740_v21  ;;  %1459 = vmatprep.subr.bf16.mxu0 %v1666_v0 }
 0x3e7   : > { %v1566_v23 = vpop.eup %1565 }
 0x3e8   : > { %1442 = vmatmul.mubr.msk.bf16.vlgmr.msra.gmra.mxu1 %vm504_vm2, %v744_v22  ;;  %v741_v24 = vmul.f32 %v1566_v23, %v1558_v4  ;;  %v1546_v4 = vld [vmem:[#allocation2] sm:$0xff]  }
 0x3e9   : > { %1455 = vmatprep.mubr.msk.bf16.mxu1 %vm1667_vm0, %v1666_v0  ;;  %1452 = vmatpush3.bf16.msra.mxu1 %v1543_v30 }
 0x3ea   : > { %v745_v25 = vpack.c.bf16 %v741_v24, %v741_v24  ;;  %1453 = vmatprep.subr.bf16.mxu1 %v1666_v0 }
 0x3ec   : > { %1448 = vmatmul.mubr.msk.bf16.vlgmr.msra.gmra.mxu0 %vm504_vm2, %v745_v25 }
 0x3ed   : > { %1463 = vmatprep.mubr.msk.bf16.mxu0 %vm1667_vm0, %v1666_v0  ;;  %1454 = vmatpush3.bf16.msra.mxu1 %v1544_v31 }
 0x3ee   : > { %1467 = vmatprep.subr.bf16.mxu1 %v1666_v0  ;;  %1460 = vmatpush3.bf16.msra.mxu0 %v1545_v2 }
 0x3ef   : > { %1461 = vmatprep.subr.bf16.mxu0 %v1666_v0 }
 0x3f2   : > { %1462 = vmatpush3.bf16.msra.mxu0 %v1546_v4 }
 0x440   : > { %v789_v26 = vpop.f32.mrf.mxu1 }
 0x442   : > { %v1431_v27 = vpop.f32.mrf.mxu1 }
 0x444   : > { %v792_v28 = vpop.f32.mrf.mxu1 }
 0x446   : > { %v1432_v29 = vpop.f32.mrf.mxu1 }
 0x4a4   : > { %v837_v32 = vpop.f32.mrf.mxu0 }
 0x4a5   : > { %940 = vrot.lane.b32.xlu1 %v837_v32, %s1673_s29  ;;  %s1362_s29 = sshll.u32 %s1763_s25, 7  ;;  %s1603_s25 = scalar_lea.vmem %s1602_s26, 256 }
 0x4a6   : > { %v1437_v33 = vpop.f32.mrf.mxu0  ;;  %s1251_s2 = scalar_lea.hbm %s2003_s12, %s1362_s29 }
 0x4a8   : > { %v840_v34 = vpop.f32.mrf.mxu0  ;;  %v885_v35 = vpop.f32.mrf.mxu1 }
 0x4a9   : > { %944 = vrot.lane.b32.xlu0 %v885_v35, %s1674_s15  ;;  %s419_s15 = scalar_lea.vmem [#allocation5], %s1330_s18 }
 0x4aa   : > { %v1438_v36 = vpop.f32.mrf.mxu0  ;;  %v1443_v37 = vpop.f32.mrf.mxu1 }
 0x4ac   : > { %v888_v38 = vpop.f32.mrf.mxu1  ;;  %v933_v39 = vpop.f32.mrf.mxu0 }
 0x4ad   : > { %948 = vrot.lane.b32.xlu1 %v933_v39, %s1675_s16  ;;  %s1253_s16 = sshll.u32 %s419_s15, 4  ;;  %s1254_s16 = int_to_ptr.vmem [resolvable:$true] %s1253_s16 }
 0x4ae   : > { %v1444_v40 = vpop.f32.mrf.mxu1  ;;  %v1449_v41 = vpop.f32.mrf.mxu0  ;;  %s1597_s19 = scalar_lea.vmem %s1254_s16, 128  ;;  %p1604_p11 = scmp.lt.s32.totalorder %s1254_s16, %s1602_s26 }
 0x4af   : > { %p1598_p6 = scmp.ne.s32.totalorder %s1254_s16, %s1597_s19  ;;  %p1605_p12 = scmp.lt.s32.totalorder %s1603_s25, %s1597_s19 }
 0x4b0   : > { %v936_v42 = vpop.f32.mrf.mxu0 }
 0x4b1   : > { %p1599_p9 = pnand %p1598_p6, %p1780_p5  ;;  %p1606_p13 = por %p1605_p12, %p1604_p11 }
 0x4b2   : > { %v1450_v43 = vpop.f32.mrf.mxu0 }
 0x4b3   : > { %v1359_v43 = vld [vmem:[%s2001_s10] ss:$0 sm:$0xff]  ;;  %p1600_p10 = pneg %p1599_p9 }
 0x4b5   : > { %p1607_p0 = pnand %p1606_p13, %p1600_p10 }
 0x517   : > { %v941_v44 = vpop.permute.xlu1 %940 }
 0x518   : > { %v951_v46 = vsel %vm504_vm2, %v789_v26, %v941_v44 }
 0x51b   : > { %v945_v45 = vpop.permute.xlu0 %944 }
 0x51c   : > { %v953_v47 = vsel %vm952_vm4, %v951_v46, %v945_v45  ;;  %v1360_v45 = vld [vmem:[%s2002_s11] ss:$0 sm:$0xff] }
 0x51f   : > { %v949_v48 = vpop.permute.xlu1 %948 }
 0x520   : > { %v955_v49 = vsel %vm954_vm5, %v953_v47, %v949_v48 }
 0x521   : > { %v956_v50 = vpack.c.bf16 %v955_v49, %v955_v49 }
 0x523   : > { %1456 = vmatmul.mubr.msk.bf16.vlgmr.msra.gmra.mxu1 %vm443_vm1, %v956_v50 }
 0x524   : > { %1475 = vmatprep.mubr.msk.bf16.mxu1 %vm1667_vm0, %v1666_v0  ;;  %1468 = vmatpush3.bf16.msra.mxu1 %v1547_v3 }
 0x525   : > { %1469 = vmatprep.subr.bf16.mxu1 %v1666_v0 }
 0x528   : > { %1470 = vmatpush3.bf16.msra.mxu1 %v1548_v5 }
 0x529   : > { %1471 = vmatprep.subr.bf16.mxu1 %v1666_v0 }
 0x52c   : > { %1472 = vmatpush3.bf16.msra.mxu1 %v1549_v16 }
 0x52d   : > { %1473 = vmatprep.subr.bf16.mxu1 %v1666_v0  ;;  %v1353_v0 = vld [vmem:[%s1998_s7] ss:$0 sm:$0xff] }
 0x530   : > { %1474 = vmatpush3.bf16.msra.mxu1 %v1550_v17 }
 0x5e3   : > { %v1017_v53 = vpop.f32.mrf.mxu1 }
 0x5e4   : > { %v1018_v54 = vadd.f32 %v1343_v51, %v1017_v53 }
 0x5e5   : > { %v1457_v55 = vpop.f32.mrf.mxu1 }
 0x5e6   : > { %v1024_v56 = vadd.f32 %v1023_v52, %v1018_v54 }
 0x5e7   : > { %v1020_v57 = vpop.f32.mrf.mxu1 }
 0x5e8   : > { %v1027_v58 = vsel %vm443_vm1, %v1024_v56, 0.0 }
 0x5e9   : > { %1028 = vadd.xlane.f32.xlu0 %v1027_v58  ;;  %v1458_v59 = vpop.f32.mrf.mxu1 }
 0x672   : > { %v1029_v60 = vpop.xlane.xlu0 %1028 }
 0x673   : > { %v1031_v61 = vmul.f32 0.03125, %v1029_v60 }
 0x675   : > { %v1032_v62 = vsub.f32 %v1024_v56, %v1031_v61 }
 0x677   : > { %v1033_v63 = vmul.f32 %v1032_v62, %v1032_v62 }
 0x679   : > { %v1034_v1 = vsel %vm443_vm1, %v1033_v63, 0.0 }
 0x67a   : > { %1035 = vadd.xlane.f32.xlu1 %v1034_v1 }
 0x703   : > { %v1036_v6 = vpop.xlane.xlu1 %1035 }
 0x704   : > { %v1037_v7 = vmul.f32 0.03125, %v1036_v6 }
 0x706   : > { %v1038_v8 = vadd.f32 1e-05, %v1037_v7 }
 0x708   : > { %1567 = vrsqrt.f32 %v1038_v8 }
 0x715   : > { %v1568_v9 = vpop.eup %1567 }
 0x716   : > { %v1040_v11 = vmul.f32 %v1568_v9, %v1032_v62 }
 0x718   : > { %v1047_v13 = vmul.f32 %v1347_v10, %v1040_v11 }
 0x71a   : > { %v1054_v14 = vadd.f32 %v1348_v12, %v1047_v13 }
 0x71c   : > { %v1055_v15 = vpack.c.bf16 %v1054_v14, %v1054_v14  ;;  %v1207_v28 = vmul.f32 0.9, %v1054_v14 }
 0x71e   : > { %1464 = vmatmul.mubr.msk.bf16.vlgmr.msra.gmra.mxu0 %vm443_vm1, %v1055_v15 }
 0x7de   : > { %v1116_v19 = vpop.f32.mrf.mxu0 }
 0x7df   : > { %v1117_v20 = vadd.f32 %v1349_v18, %v1116_v19 }
 0x7e0   : > { %v1465_v21 = vpop.f32.mrf.mxu0 }
 0x7e1   : > { %v1122_v22 = vmax.f32 %v1117_v20, 0.0 }
 0x7e2   : > { %v1119_v23 = vpop.f32.mrf.mxu0 }
 0x7e3   : > { %v1123_v24 = vpack.c.bf16 %v1122_v22, %v1122_v22 }
 0x7e4   : > { %v1466_v25 = vpop.f32.mrf.mxu0 }
 0x7e5   : > { %1476 = vmatmul.mubr.msk.bf16.vlgmr.msra.gmra.mxu1 %vm1163_vm6, %v1123_v24 }
 0x8a5   : > { %v1201_v26 = vpop.f32.mrf.mxu1 }
 0x8a6   : > { %v1202_v27 = vadd.f32 %v1353_v0, %v1201_v26 }
 0x8a7   : > { %v1477_v29 = vpop.f32.mrf.mxu1 }
 0x8a8   : > { %v1208_v30 = vadd.f32 %v1207_v28, %v1202_v27 }
 0x8a9   : > { %v1204_v31 = vpop.f32.mrf.mxu1 }
 0x8aa   : > { %v1211_v32 = vsel %vm443_vm1, %v1208_v30, 0.0 }
 0x8ab   : > { %1212 = vadd.xlane.f32.xlu0 %v1211_v32  ;;  %v1478_v33 = vpop.f32.mrf.mxu1 }
 0x934   : > { %v1213_v34 = vpop.xlane.xlu0 %1212 }
 0x935   : > { %v1214_v35 = vmul.f32 0.03125, %v1213_v34 }
 0x937   : > { %v1215_v36 = vsub.f32 %v1208_v30, %v1214_v35 }
 0x939   : > { %v1216_v37 = vmul.f32 %v1215_v36, %v1215_v36 }
 0x93b   : > { %v1217_v38 = vsel %vm443_vm1, %v1216_v37, 0.0 }
 0x93c   : > { %1218 = vadd.xlane.f32.xlu0 %v1217_v38 }
 0x9c5   : > { %v1219_v39 = vpop.xlane.xlu0 %1218 }
 0x9c6   : > { %v1220_v40 = vmul.f32 0.03125, %v1219_v39 }
 0x9c8   : > { %v1221_v41 = vadd.f32 1e-05, %v1220_v40 }
 0x9ca   : > { %1569 = vrsqrt.f32 %v1221_v41 }
 0x9d7   : > { %v1570_v42 = vpop.eup %1569 }
 0x9d8   : > { %v1223_v44 = vmul.f32 %v1570_v42, %v1215_v36 }
 0x9da   : > { %v1230_v46 = vmul.f32 %v1359_v43, %v1223_v44 }
 0x9dc   : > { %v1237_v47 = vadd.f32 %v1360_v45, %v1230_v46 }
 0x9de   : > { %1238 = vst.msk [vmem:[%s419_s15] sm:$0xff] %vm443_vm1, %v1237_v47 }
 0x9df   : > { %1610 = shalt.err (!%p1607_p0)
}
 0x9e0   : > { %s1611_s0 = scalar_lea.hbm %s1251_s2, 128  ;;  %s1615_s18 = scalar_lea.hbm %s2003_s12, 256 }
 0x9e1   : > { %p1612_p1 = scmp.ne.s32.totalorder %s1251_s2, %s1611_s0  ;;  %p1616_p4 = scmp.lt.s32.totalorder %s1251_s2, %s2003_s12 }
 0x9e2   : > { %p1617_p7 = scmp.lt.s32.totalorder %s1615_s18, %s1611_s0 }
 0x9e3   : > { %p1613_p2 = pnand %p1612_p1, %p1780_p5 }
 0x9e4   : > { %p1618_p8 = por %p1617_p7, %p1616_p4 }
 0x9e5   : > { %p1614_p3 = pneg %p1613_p2 }
 0x9e7   : > { %p1619_p6 = pnand %p1618_p8, %p1614_p3 }
 0x9e9   : > { %1622 = shalt.err (!%p1619_p6)
}
 0x9ea   : > { %1483 = dma.vmem_to_hbm [thread:$0]  (%p1780_p5), %s1254_s16, 128, %s1251_s2, %s1240_s3  }
 0x9eb PF: > { %p1495_p9 = scmp.ge.s32.totalorder %s1661_s24, 2  ;;  %s1265_s15 = sand.u32 1, %s1649_s21  }
 0x9ec   : > { %p2015_p10 = scmp.ne.s32.totalorder %s2009_s14, 0  ;;  %s1266_s19 = scalar_lea.sflag [#allocation4], %s1265_s15 }
 0x9ee   : > { %p1490_p11 = pnand %p1495_p9, %p2015_p10 }
 0x9f0   : > { %p1491_p12 = pneg %p1490_p11 }
 0x9f2   : > { %1644 = dma.done.wait (%p1491_p12), %s1266_s19, 128  }
 0x9f3   : > { %1646 = vsyncadd (%p1491_p12), %s1266_s19, 4294967168  ;;  %p23_p13 = scmp.ge.s32.totalorder %s1767_s27, 4   ;;  %s2016_s21 = smov %s1653_s22 }
 0x9f4   : > { %s2017_s22 = smov %s1657_s23  ;;  %s2018_s23 = smov %s1778_s30 }
 0x9f5   : > { %s2019_s24 = smov %s1767_s27  ;;  %25 = sbr.rel (!%p23_p13) target bundleno = 9 (0x9), region = 108 }
 0x9fa   :  { %1271 = vsyncpa [#allocation3], 1 }
 0x9fb   :  { %1273 = vsyncpa [#allocation3 + $0x1], 1 }
 0x9fc   :  { %1274 = vsyncpa [#allocation4], 1 }
 0x9fd   :  { %1276 = vsyncpa [#allocation4 + $0x1], 1 }

</bundles_post_ra>
